<compile_context>
chip_gen: v7x
topology: tpu7x:2x2x1
jax: 0.10.0
libtpu: 0.0.40
codegen_flags: <defaults>
</compile_context>

<pallas_src>
import math

import jax
import jax.numpy as jnp
import numpy as np
from jax.experimental import pallas as pl
from jax.experimental.pallas import tpu as pltpu


# ----------------------------- Pallas kernel --------------------------------


def _make_fused_kernel(b_sz, h, w, cin, cout, pad_k, inv_n):
    """in-kernel im2col + conv matmul + BN(batch stats) + gate, lane-dense.

    Ref shapes (lane axis = wc = W*Cout = 128):
      xp_ref    : (B*(H+2), (W+2)*Cin)  padded NHWC input, flattened 2D
      wbig_ref  : (pad_k, wc)           tap-major block-diagonal conv weights
      gamma_ref : (1, wc)               BN gamma tiled per w-group
      beta_ref  : (1, wc)               BN beta tiled per w-group
      act_ref   : (B, wc)               gate activation tiled per w-group
      o_ref     : (B*H, wc)             output = (B, H, W, Cout) lane-dense
      lhs_ref   : (B*H, pad_k)          VMEM scratch: im2col patch matrix
    """
    wc = w * cout
    hp = h + 2                 # padded height
    wcin = w * cin             # lane width of one tap slab (64)
    n_taps = 9

    def group_sum(v):
        # Per-channel total replicated into every w-group: exact log-step
        # all-reduce over lane groups of stride `cout` (W is a power of two,
        # wc a multiple of 128 -- both asserted by the wrapper).  Rolls run on
        # the XLU, adds on the VPU.
        s = v
        sh = cout
        while sh < wc:
            s = s + pltpu.roll(s, sh, axis=1)
            sh *= 2
        return s

    def kernel(xp_ref, wbig_ref, gamma_ref, beta_ref, act_ref, o_ref, lhs_ref):
        # ---- in-kernel im2col (tap-major K ordering) -----------------------
        # lane k = tap*W*Cin + w*Cin + c ; K padded 576 -> 640, tail zeroed so
        # the (zero) trailing weight rows never see uninitialized VMEM.
        lhs_ref[:, n_taps * wcin:] = jnp.zeros(
            (b_sz * h, pad_k - n_taps * wcin), jnp.float32)
        for b in range(b_sz):
            for kh in range(3):
                for kw in range(3):
                    tap = kh * 3 + kw
                    lhs_ref[b * h:(b + 1) * h,
                            tap * wcin:(tap + 1) * wcin] = xp_ref[
                        b * hp + kh: b * hp + kh + h,
                        kw * cin: kw * cin + wcin]

        # ---- 3x3 conv: one MXU contraction; block-diagonal weight makes the
        # result lane-dense (lane = w*Cout + c).  Default matmul precision is
        # kept (validated at 2e-3 for effective K = 9*Cin = 36); no conv bias
        # (it cancels under batch-stat BN).
        y = jnp.dot(lhs_ref[...], wbig_ref[...],
                    preferred_element_type=jnp.float32)

        # ---- BatchNorm batch statistics (training mode, biased variance),
        # centered two-pass accumulation.
        mean = group_sum(jnp.sum(y, axis=0, keepdims=True)) * inv_n
        d = y - mean
        var = group_sum(jnp.sum(d * d, axis=0, keepdims=True)) * inv_n
        scale = gamma_ref[...] * jax.lax.rsqrt(var + 1e-5)

        # ---- fold BN + gate into one FMA per element; broadcast the compact
        # (B, wc) gate over the H rows with per-batch aligned full-lane stores.
        for b in range(b_sz):
            ab = act_ref[b:b + 1, :]                     # (1, wc)
            o_ref[b * h:(b + 1) * h, :] = (
                d[b * h:(b + 1) * h, :] * (scale * ab) + beta_ref[...] * ab)

    return kernel


# --------------------------- hoisted constant prep ---------------------------


def prepare_constants(params, w, cout):
    """Everything derived from weights only; built ONCE, outside the jit."""
    cin = params["conv_w"].shape[1]
    wc = w * cout
    n_taps = 9
    k_raw = n_taps * w * cin
    pad_k = ((k_raw + 127) // 128) * 128                 # 576 -> 640

    # (Cout, Cin, 3, 3) OIHW -> (tap, cin, cout)
    w2 = np.transpose(np.asarray(params["conv_w"]), (2, 3, 1, 0))
    w2 = w2.reshape(n_taps, cin, cout).astype(np.float32)
    eye = np.eye(w, dtype=np.float32)
    # wbig[(t*W + w)*Cin + c, v*Cout + o] = w2[t, c, o] * (w == v)
    wbig = np.einsum("tco,wv->twcvo", w2, eye).reshape(k_raw, wc)
    wbig = np.pad(wbig, ((0, pad_k - k_raw), (0, 0)))

    gamma_row = np.tile(np.asarray(params["gamma"]), w).reshape(1, wc)
    beta_row = np.tile(np.asarray(params["beta"]), w).reshape(1, wc)
    # conv bias intentionally omitted: per-channel constant added before
    # batch-stat BatchNorm cancels exactly in (y - mean).

    return {
        "wbig": jnp.asarray(wbig, dtype=jnp.float32),
        "gamma_row": jnp.asarray(gamma_row, dtype=jnp.float32),
        "beta_row": jnp.asarray(beta_row, dtype=jnp.float32),
    }


# ------------------------------- wrapper -------------------------------------


def gated_conv_bn(x_nchw, ratios, params, consts):
    """Forward pass of GatedConv_BN. x_nchw: (B, Cin, H, W) float32."""
    b_sz, cin, h, w = x_nchw.shape
    cout = params["gamma"].shape[0]
    wc = w * cout
    # In-kernel per-channel combine uses log-step lane rotations; requires W
    # to be a power of two and a lane-dense (multiple-of-128) output row.
    assert w & (w - 1) == 0, "W must be a power of two"
    assert wc % 128 == 0, "W*Cout must be a multiple of 128 for lane-dense IO"

    x = x_nchw.astype(jnp.float32)

    # ---- gate path (depends only on x): tiny MLP + top-k mask, in XLA ----
    # TODO(synk): argsort/rank-based top-k has no clean Pallas equivalent; the
    # O(B*C) gate MLP + mask stays in XLA glue.
    ss = jnp.mean(jnp.abs(x), axis=(2, 3))                          # (B, Cin)
    hidden = jnp.maximum(ss @ params["g1_w"].T + params["g1_b"], 0.0)
    gate_out = 1.5 * jax.nn.sigmoid(hidden @ params["g2_w"].T + params["g2_b"])
    ranks = jnp.argsort(jnp.argsort(gate_out, axis=1), axis=1)
    topks = jnp.round(ratios * cout).astype(jnp.int32)
    mask = ranks > (cout - 1 - topks.reshape(-1, 1))
    active = gate_out * mask.astype(jnp.float32)                    # (B, Cout)
    act_row = jnp.tile(active, (1, w))                               # (B, wc)

    # ---- only per-call layout op: padded NHWC input, flattened to 2D ----
    x_nhwc = jnp.transpose(x, (0, 2, 3, 1))                         # (B,H,W,Cin)
    xp = jnp.pad(x_nhwc, ((0, 0), (1, 1), (1, 1), (0, 0)))          # padding=1
    xp2d = xp.reshape(b_sz * (h + 2), (w + 2) * cin)                # (36, 72)

    pad_k = consts["wbig"].shape[0]
    inv_n = 1.0 / float(b_sz * h * w)
    kernel = _make_fused_kernel(b_sz, h, w, cin, cout, pad_k, inv_n)

    out = pl.pallas_call(
        kernel,
        out_shape=jax.ShapeDtypeStruct((b_sz * h, wc), jnp.float32),
        grid_spec=pltpu.PrefetchScalarGridSpec(
            num_scalar_prefetch=0,
            grid=(1,),
            in_specs=[
                pl.BlockSpec((b_sz * (h + 2), (w + 2) * cin), lambda i: (0, 0)),
                pl.BlockSpec((pad_k, wc), lambda i: (0, 0)),
                pl.BlockSpec((1, wc), lambda i: (0, 0)),
                pl.BlockSpec((1, wc), lambda i: (0, 0)),
                pl.BlockSpec((b_sz, wc), lambda i: (0, 0)),
            ],
            out_specs=pl.BlockSpec((b_sz * h, wc), lambda i: (0, 0)),
            scratch_shapes=[pltpu.VMEM((b_sz * h, pad_k), jnp.float32)],
        ),
        compiler_params=pltpu.CompilerParams(
            dimension_semantics=("arbitrary",)),
    )(xp2d, consts["wbig"], consts["gamma_row"], consts["beta_row"], act_row)

    # (B*H, W*Cout) lane-dense -> (B, H, W, Cout) -> NCHW
    return jnp.transpose(out.reshape(b_sz, h, w, cout), (0, 3, 1, 2))


# --------------------------- pure-JAX reference ------------------------------


def reference_forward(x_nchw, ratios, params):
    cout = params["conv_w"].shape[0]
    ss = jnp.mean(jnp.abs(x_nchw), axis=(2, 3))
    hidden = jnp.maximum(ss @ params["g1_w"].T + params["g1_b"], 0.0)
    gate_out = 1.5 * jax.nn.sigmoid(hidden @ params["g2_w"].T + params["g2_b"])
    ranks = jnp.argsort(jnp.argsort(gate_out, axis=1), axis=1)
    topks = jnp.round(ratios * cout).astype(jnp.int32)
    mask = ranks > (cout - 1 - topks.reshape(-1, 1))
    active = (gate_out * mask.astype(jnp.float32))[:, :, None, None]
    y = jax.lax.conv_general_dilated(
        x_nchw, params["conv_w"], window_strides=(1, 1),
        padding=((1, 1), (1, 1)),
        dimension_numbers=("NCHW", "OIHW", "NCHW"),
        precision=jax.lax.Precision.HIGHEST)
    y = y + params["conv_b"][None, :, None, None]   # bias kept here on purpose
    mean = jnp.mean(y, axis=(0, 2, 3), keepdims=True)
    var = jnp.mean((y - mean) ** 2, axis=(0, 2, 3), keepdims=True)
    yn = ((y - mean) * jax.lax.rsqrt(var + 1e-5)
          * params["gamma"][None, :, None, None]
          + params["beta"][None, :, None, None])
    return yn * active


# --------------------------------- main --------------------------------------


if __name__ == "__main__":
    B, C_IN, C_OUT, H, W = 2, 4, 8, 16, 16

    key = jax.random.PRNGKey(0)
    k_x, k_cw, k_cb, k_g1, k_g2 = jax.random.split(key, 5)

    x = jax.random.normal(k_x, (B, C_IN, H, W), dtype=jnp.float32)
    ratios = jnp.array([0.5, 0.75], dtype=jnp.float32)

    params = {
        # conv: deterministic synthetic init (exact init scheme irrelevant)
        "conv_w": 0.2 * jax.random.normal(k_cw, (C_OUT, C_IN, 3, 3),
                                          dtype=jnp.float32),
        "conv_b": 0.1 * jax.random.normal(k_cb, (C_OUT,), dtype=jnp.float32),
        # gate MLP: module init = normal(0, sqrt(2/fan_in)), zero bias
        "g1_w": math.sqrt(2.0 / C_IN)
                * jax.random.normal(k_g1, (10, C_IN), dtype=jnp.float32),
        "g1_b": jnp.zeros((10,), dtype=jnp.float32),
        "g2_w": math.sqrt(2.0 / 10.0)
                * jax.random.normal(k_g2, (C_OUT, 10), dtype=jnp.float32),
        "g2_b": jnp.zeros((C_OUT,), dtype=jnp.float32),
        # BatchNorm affine params (default init)
        "gamma": jnp.ones((C_OUT,), dtype=jnp.float32),
        "beta": jnp.zeros((C_OUT,), dtype=jnp.float32),
    }

    # Hoisted once, outside the per-forward (jitted) path.
    consts = prepare_constants(params, W, C_OUT)

    fwd = jax.jit(gated_conv_bn)
    out = jax.block_until_ready(fwd(x, ratios, params, consts))

    ref = jax.block_until_ready(reference_forward(x, ratios, params))
    assert out.shape == (B, C_OUT, H, W)
    np.testing.assert_allclose(np.asarray(out), np.asarray(ref),
                               rtol=2e-3, atol=2e-3)

    print("KERNEL_OK")
</pallas_src>

<mosaic_0001>
module attributes {stable_mosaic.version = 11 : i64} {
  func.func @kernel(%arg0: i32, %arg1: memref<36x72xf32, #tpu.memory_space<vmem>>, %arg2: memref<640x128xf32, #tpu.memory_space<vmem>>, %arg3: memref<1x128xf32, #tpu.memory_space<vmem>>, %arg4: memref<1x128xf32, #tpu.memory_space<vmem>>, %arg5: memref<2x128xf32, #tpu.memory_space<vmem>>, %arg6: memref<32x128xf32, #tpu.memory_space<vmem>>, %arg7: memref<32x640xf32, #tpu.memory_space<vmem>>) attributes {dimension_semantics = [#tpu.dimension_semantics<arbitrary>], iteration_bounds = array<i64: 1>, scalar_prefetch = 0 : i64, scratch_operands = 1 : i64, tpu.core_type = #tpu.core_type<tc>, window_params = [{pipeline_mode = #tpu.pipeline_mode<synchronous>, transform_indices = @transform_0, window_bounds = array<i64: 36, 72>}, {pipeline_mode = #tpu.pipeline_mode<synchronous>, transform_indices = @transform_1, window_bounds = array<i64: 640, 128>}, {pipeline_mode = #tpu.pipeline_mode<synchronous>, transform_indices = @transform_2, window_bounds = array<i64: 1, 128>}, {pipeline_mode = #tpu.pipeline_mode<synchronous>, transform_indices = @transform_3, window_bounds = array<i64: 1, 128>}, {pipeline_mode = #tpu.pipeline_mode<synchronous>, transform_indices = @transform_4, window_bounds = array<i64: 2, 128>}, {pipeline_mode = #tpu.pipeline_mode<synchronous>, transform_indices = @transform_5, window_bounds = array<i64: 32, 128>}]} {
    %cst = arith.constant 0.000000e+00 : f32
    %0 = vector.broadcast %cst : f32 to vector<32x64xf32>
    %c0 = arith.constant 0 : index
    %c576 = arith.constant 576 : index
    %1 = vector.load %arg7[%c0, %c576] : memref<32x640xf32, #tpu.memory_space<vmem>>, vector<32x64xf32>
    tpu.vector_store %arg7[%c0, %c576], %0 {strides = array<i32>} : memref<32x640xf32, #tpu.memory_space<vmem>>, vector<32x64xf32>,
    %c0_0 = arith.constant 0 : index
    %c0_1 = arith.constant 0 : index
    %2 = vector.load %arg1[%c0_0, %c0_1] : memref<36x72xf32, #tpu.memory_space<vmem>>, vector<16x64xf32>
    %c0_2 = arith.constant 0 : index
    %c0_3 = arith.constant 0 : index
    %3 = vector.load %arg7[%c0_2, %c0_3] : memref<32x640xf32, #tpu.memory_space<vmem>>, vector<16x64xf32>
    tpu.vector_store %arg7[%c0_2, %c0_3], %2 {strides = array<i32>} : memref<32x640xf32, #tpu.memory_space<vmem>>, vector<16x64xf32>,
    %c0_4 = arith.constant 0 : index
    %c4 = arith.constant 4 : index
    %4 = vector.load %arg1[%c0_4, %c4] : memref<36x72xf32, #tpu.memory_space<vmem>>, vector<16x64xf32>
    %c0_5 = arith.constant 0 : index
    %c64 = arith.constant 64 : index
    %5 = vector.load %arg7[%c0_5, %c64] : memref<32x640xf32, #tpu.memory_space<vmem>>, vector<16x64xf32>
    tpu.vector_store %arg7[%c0_5, %c64], %4 {strides = array<i32>} : memref<32x640xf32, #tpu.memory_space<vmem>>, vector<16x64xf32>,
    %c0_6 = arith.constant 0 : index
    %c8 = arith.constant 8 : index
    %6 = vector.load %arg1[%c0_6, %c8] : memref<36x72xf32, #tpu.memory_space<vmem>>, vector<16x64xf32>
    %c0_7 = arith.constant 0 : index
    %c128 = arith.constant 128 : index
    %7 = vector.load %arg7[%c0_7, %c128] : memref<32x640xf32, #tpu.memory_space<vmem>>, vector<16x64xf32>
    tpu.vector_store %arg7[%c0_7, %c128], %6 {strides = array<i32>} : memref<32x640xf32, #tpu.memory_space<vmem>>, vector<16x64xf32>,
    %c1 = arith.constant 1 : index
    %c0_8 = arith.constant 0 : index
    %8 = vector.load %arg1[%c1, %c0_8] : memref<36x72xf32, #tpu.memory_space<vmem>>, vector<16x64xf32>
    %c0_9 = arith.constant 0 : index
    %c192 = arith.constant 192 : index
    %9 = vector.load %arg7[%c0_9, %c192] : memref<32x640xf32, #tpu.memory_space<vmem>>, vector<16x64xf32>
    tpu.vector_store %arg7[%c0_9, %c192], %8 {strides = array<i32>} : memref<32x640xf32, #tpu.memory_space<vmem>>, vector<16x64xf32>,
    %c1_10 = arith.constant 1 : index
    %c4_11 = arith.constant 4 : index
    %10 = vector.load %arg1[%c1_10, %c4_11] : memref<36x72xf32, #tpu.memory_space<vmem>>, vector<16x64xf32>
    %c0_12 = arith.constant 0 : index
    %c256 = arith.constant 256 : index
    %11 = vector.load %arg7[%c0_12, %c256] : memref<32x640xf32, #tpu.memory_space<vmem>>, vector<16x64xf32>
    tpu.vector_store %arg7[%c0_12, %c256], %10 {strides = array<i32>} : memref<32x640xf32, #tpu.memory_space<vmem>>, vector<16x64xf32>,
    %c1_13 = arith.constant 1 : index
    %c8_14 = arith.constant 8 : index
    %12 = vector.load %arg1[%c1_13, %c8_14] : memref<36x72xf32, #tpu.memory_space<vmem>>, vector<16x64xf32>
    %c0_15 = arith.constant 0 : index
    %c320 = arith.constant 320 : index
    %13 = vector.load %arg7[%c0_15, %c320] : memref<32x640xf32, #tpu.memory_space<vmem>>, vector<16x64xf32>
    tpu.vector_store %arg7[%c0_15, %c320], %12 {strides = array<i32>} : memref<32x640xf32, #tpu.memory_space<vmem>>, vector<16x64xf32>,
    %c2 = arith.constant 2 : index
    %c0_16 = arith.constant 0 : index
    %14 = vector.load %arg1[%c2, %c0_16] : memref<36x72xf32, #tpu.memory_space<vmem>>, vector<16x64xf32>
    %c0_17 = arith.constant 0 : index
    %c384 = arith.constant 384 : index
    %15 = vector.load %arg7[%c0_17, %c384] : memref<32x640xf32, #tpu.memory_space<vmem>>, vector<16x64xf32>
    tpu.vector_store %arg7[%c0_17, %c384], %14 {strides = array<i32>} : memref<32x640xf32, #tpu.memory_space<vmem>>, vector<16x64xf32>,
    %c2_18 = arith.constant 2 : index
    %c4_19 = arith.constant 4 : index
    %16 = vector.load %arg1[%c2_18, %c4_19] : memref<36x72xf32, #tpu.memory_space<vmem>>, vector<16x64xf32>
    %c0_20 = arith.constant 0 : index
    %c448 = arith.constant 448 : index
    %17 = vector.load %arg7[%c0_20, %c448] : memref<32x640xf32, #tpu.memory_space<vmem>>, vector<16x64xf32>
    tpu.vector_store %arg7[%c0_20, %c448], %16 {strides = array<i32>} : memref<32x640xf32, #tpu.memory_space<vmem>>, vector<16x64xf32>,
    %c2_21 = arith.constant 2 : index
    %c8_22 = arith.constant 8 : index
    %18 = vector.load %arg1[%c2_21, %c8_22] : memref<36x72xf32, #tpu.memory_space<vmem>>, vector<16x64xf32>
    %c0_23 = arith.constant 0 : index
    %c512 = arith.constant 512 : index
    %19 = vector.load %arg7[%c0_23, %c512] : memref<32x640xf32, #tpu.memory_space<vmem>>, vector<16x64xf32>
    tpu.vector_store %arg7[%c0_23, %c512], %18 {strides = array<i32>} : memref<32x640xf32, #tpu.memory_space<vmem>>, vector<16x64xf32>,
    %c18 = arith.constant 18 : index
    %c0_24 = arith.constant 0 : index
    %20 = vector.load %arg1[%c18, %c0_24] : memref<36x72xf32, #tpu.memory_space<vmem>>, vector<16x64xf32>
    %c16 = arith.constant 16 : index
    %c0_25 = arith.constant 0 : index
    %21 = vector.load %arg7[%c16, %c0_25] : memref<32x640xf32, #tpu.memory_space<vmem>>, vector<16x64xf32>
    tpu.vector_store %arg7[%c16, %c0_25], %20 {strides = array<i32>} : memref<32x640xf32, #tpu.memory_space<vmem>>, vector<16x64xf32>,
    %c18_26 = arith.constant 18 : index
    %c4_27 = arith.constant 4 : index
    %22 = vector.load %arg1[%c18_26, %c4_27] : memref<36x72xf32, #tpu.memory_space<vmem>>, vector<16x64xf32>
    %c16_28 = arith.constant 16 : index
    %c64_29 = arith.constant 64 : index
    %23 = vector.load %arg7[%c16_28, %c64_29] : memref<32x640xf32, #tpu.memory_space<vmem>>, vector<16x64xf32>
    tpu.vector_store %arg7[%c16_28, %c64_29], %22 {strides = array<i32>} : memref<32x640xf32, #tpu.memory_space<vmem>>, vector<16x64xf32>,
    %c18_30 = arith.constant 18 : index
    %c8_31 = arith.constant 8 : index
    %24 = vector.load %arg1[%c18_30, %c8_31] : memref<36x72xf32, #tpu.memory_space<vmem>>, vector<16x64xf32>
    %c16_32 = arith.constant 16 : index
    %c128_33 = arith.constant 128 : index
    %25 = vector.load %arg7[%c16_32, %c128_33] : memref<32x640xf32, #tpu.memory_space<vmem>>, vector<16x64xf32>
    tpu.vector_store %arg7[%c16_32, %c128_33], %24 {strides = array<i32>} : memref<32x640xf32, #tpu.memory_space<vmem>>, vector<16x64xf32>,
    %c19 = arith.constant 19 : index
    %c0_34 = arith.constant 0 : index
    %26 = vector.load %arg1[%c19, %c0_34] : memref<36x72xf32, #tpu.memory_space<vmem>>, vector<16x64xf32>
    %c16_35 = arith.constant 16 : index
    %c192_36 = arith.constant 192 : index
    %27 = vector.load %arg7[%c16_35, %c192_36] : memref<32x640xf32, #tpu.memory_space<vmem>>, vector<16x64xf32>
    tpu.vector_store %arg7[%c16_35, %c192_36], %26 {strides = array<i32>} : memref<32x640xf32, #tpu.memory_space<vmem>>, vector<16x64xf32>,
    %c19_37 = arith.constant 19 : index
    %c4_38 = arith.constant 4 : index
    %28 = vector.load %arg1[%c19_37, %c4_38] : memref<36x72xf32, #tpu.memory_space<vmem>>, vector<16x64xf32>
    %c16_39 = arith.constant 16 : index
    %c256_40 = arith.constant 256 : index
    %29 = vector.load %arg7[%c16_39, %c256_40] : memref<32x640xf32, #tpu.memory_space<vmem>>, vector<16x64xf32>
    tpu.vector_store %arg7[%c16_39, %c256_40], %28 {strides = array<i32>} : memref<32x640xf32, #tpu.memory_space<vmem>>, vector<16x64xf32>,
    %c19_41 = arith.constant 19 : index
    %c8_42 = arith.constant 8 : index
    %30 = vector.load %arg1[%c19_41, %c8_42] : memref<36x72xf32, #tpu.memory_space<vmem>>, vector<16x64xf32>
    %c16_43 = arith.constant 16 : index
    %c320_44 = arith.constant 320 : index
    %31 = vector.load %arg7[%c16_43, %c320_44] : memref<32x640xf32, #tpu.memory_space<vmem>>, vector<16x64xf32>
    tpu.vector_store %arg7[%c16_43, %c320_44], %30 {strides = array<i32>} : memref<32x640xf32, #tpu.memory_space<vmem>>, vector<16x64xf32>,
    %c20 = arith.constant 20 : index
    %c0_45 = arith.constant 0 : index
    %32 = vector.load %arg1[%c20, %c0_45] : memref<36x72xf32, #tpu.memory_space<vmem>>, vector<16x64xf32>
    %c16_46 = arith.constant 16 : index
    %c384_47 = arith.constant 384 : index
    %33 = vector.load %arg7[%c16_46, %c384_47] : memref<32x640xf32, #tpu.memory_space<vmem>>, vector<16x64xf32>
    tpu.vector_store %arg7[%c16_46, %c384_47], %32 {strides = array<i32>} : memref<32x640xf32, #tpu.memory_space<vmem>>, vector<16x64xf32>,
    %c20_48 = arith.constant 20 : index
    %c4_49 = arith.constant 4 : index
    %34 = vector.load %arg1[%c20_48, %c4_49] : memref<36x72xf32, #tpu.memory_space<vmem>>, vector<16x64xf32>
    %c16_50 = arith.constant 16 : index
    %c448_51 = arith.constant 448 : index
    %35 = vector.load %arg7[%c16_50, %c448_51] : memref<32x640xf32, #tpu.memory_space<vmem>>, vector<16x64xf32>
    tpu.vector_store %arg7[%c16_50, %c448_51], %34 {strides = array<i32>} : memref<32x640xf32, #tpu.memory_space<vmem>>, vector<16x64xf32>,
    %c20_52 = arith.constant 20 : index
    %c8_53 = arith.constant 8 : index
    %36 = vector.load %arg1[%c20_52, %c8_53] : memref<36x72xf32, #tpu.memory_space<vmem>>, vector<16x64xf32>
    %c16_54 = arith.constant 16 : index
    %c512_55 = arith.constant 512 : index
    %37 = vector.load %arg7[%c16_54, %c512_55] : memref<32x640xf32, #tpu.memory_space<vmem>>, vector<16x64xf32>
    tpu.vector_store %arg7[%c16_54, %c512_55], %36 {strides = array<i32>} : memref<32x640xf32, #tpu.memory_space<vmem>>, vector<16x64xf32>,
    %c0_56 = arith.constant 0 : index
    %c0_57 = arith.constant 0 : index
    %38 = vector.load %arg7[%c0_56, %c0_57] : memref<32x640xf32, #tpu.memory_space<vmem>>, vector<32x640xf32>
    %c0_58 = arith.constant 0 : index
    %c0_59 = arith.constant 0 : index
    %39 = vector.load %arg2[%c0_58, %c0_59] : memref<640x128xf32, #tpu.memory_space<vmem>>, vector<640x128xf32>
    %cst_60 = arith.constant dense<0.000000e+00> : vector<32x128xf32>
    %40 = tpu.matmul %38, %39, %cst_60 {dimension_numbers = #tpu.dot_dimension_numbers<[1], [0], [0], [1], [0, 0, 1, 1], [], []>} : vector<32x640xf32>, vector<640x128xf32>, vector<32x128xf32> -> vector<32x128xf32>
    %cst_61 = arith.constant dense<0.000000e+00> : vector<128xf32>
    %41 = vector.multi_reduction <add>, %40, %cst_61 [0] : vector<32x128xf32> to vector<128xf32>
    %42 = vector.shape_cast %41 : vector<128xf32> to vector<1x128xf32>
    %c8_i32 = arith.constant 8 : i32
    %43 = tpu.dynamic_rotate %42 by %c8_i32 dim 1 : vector<1x128xf32>, i32 -> vector<1x128xf32>
    %44 = arith.addf %42, %43 : vector<1x128xf32>
    %c16_i32 = arith.constant 16 : i32
    %45 = tpu.dynamic_rotate %44 by %c16_i32 dim 1 : vector<1x128xf32>, i32 -> vector<1x128xf32>
    %46 = arith.addf %44, %45 : vector<1x128xf32>
    %c32_i32 = arith.constant 32 : i32
    %47 = tpu.dynamic_rotate %46 by %c32_i32 dim 1 : vector<1x128xf32>, i32 -> vector<1x128xf32>
    %48 = arith.addf %46, %47 : vector<1x128xf32>
    %c64_i32 = arith.constant 64 : i32
    %49 = tpu.dynamic_rotate %48 by %c64_i32 dim 1 : vector<1x128xf32>, i32 -> vector<1x128xf32>
    %50 = arith.addf %48, %49 : vector<1x128xf32>
    %cst_62 = arith.constant 0.001953125 : f32
    %51 = vector.broadcast %cst_62 : f32 to vector<1x128xf32>
    %52 = arith.mulf %50, %51 : vector<1x128xf32>
    %53 = vector.broadcast %52 : vector<1x128xf32> to vector<32x128xf32>
    %54 = arith.subf %40, %53 : vector<32x128xf32>
    %55 = arith.mulf %54, %54 : vector<32x128xf32>
    %cst_63 = arith.constant dense<0.000000e+00> : vector<128xf32>
    %56 = vector.multi_reduction <add>, %55, %cst_63 [0] : vector<32x128xf32> to vector<128xf32>
    %57 = vector.shape_cast %56 : vector<128xf32> to vector<1x128xf32>
    %c8_i32_64 = arith.constant 8 : i32
    %58 = tpu.dynamic_rotate %57 by %c8_i32_64 dim 1 : vector<1x128xf32>, i32 -> vector<1x128xf32>
    %59 = arith.addf %57, %58 : vector<1x128xf32>
    %c16_i32_65 = arith.constant 16 : i32
    %60 = tpu.dynamic_rotate %59 by %c16_i32_65 dim 1 : vector<1x128xf32>, i32 -> vector<1x128xf32>
    %61 = arith.addf %59, %60 : vector<1x128xf32>
    %c32_i32_66 = arith.constant 32 : i32
    %62 = tpu.dynamic_rotate %61 by %c32_i32_66 dim 1 : vector<1x128xf32>, i32 -> vector<1x128xf32>
    %63 = arith.addf %61, %62 : vector<1x128xf32>
    %c64_i32_67 = arith.constant 64 : i32
    %64 = tpu.dynamic_rotate %63 by %c64_i32_67 dim 1 : vector<1x128xf32>, i32 -> vector<1x128xf32>
    %65 = arith.addf %63, %64 : vector<1x128xf32>
    %cst_68 = arith.constant 0.001953125 : f32
    %66 = vector.broadcast %cst_68 : f32 to vector<1x128xf32>
    %67 = arith.mulf %65, %66 : vector<1x128xf32>
    %c0_69 = arith.constant 0 : index
    %c0_70 = arith.constant 0 : index
    %68 = vector.load %arg3[%c0_69, %c0_70] : memref<1x128xf32, #tpu.memory_space<vmem>>, vector<1x128xf32>
    %cst_71 = arith.constant 9.99999974E-6 : f32
    %69 = vector.broadcast %cst_71 : f32 to vector<1x128xf32>
    %70 = arith.addf %67, %69 : vector<1x128xf32>
    %71 = math.rsqrt %70 : vector<1x128xf32>
    %72 = arith.mulf %68, %71 : vector<1x128xf32>
    %c0_72 = arith.constant 0 : index
    %c0_73 = arith.constant 0 : index
    %73 = vector.load %arg5[%c0_72, %c0_73] : memref<2x128xf32, #tpu.memory_space<vmem>>, vector<1x128xf32>
    %74 = vector.extract_strided_slice %54 {offsets = [0, 0], sizes = [16, 128], strides = [1, 1]} : vector<32x128xf32> to vector<16x128xf32>
    %75 = arith.mulf %72, %73 : vector<1x128xf32>
    %76 = vector.broadcast %75 : vector<1x128xf32> to vector<16x128xf32>
    %77 = arith.mulf %74, %76 : vector<16x128xf32>
    %c0_74 = arith.constant 0 : index
    %c0_75 = arith.constant 0 : index
    %78 = vector.load %arg4[%c0_74, %c0_75] : memref<1x128xf32, #tpu.memory_space<vmem>>, vector<1x128xf32>
    %79 = arith.mulf %78, %73 : vector<1x128xf32>
    %80 = vector.broadcast %79 : vector<1x128xf32> to vector<16x128xf32>
    %81 = arith.addf %77, %80 : vector<16x128xf32>
    %c0_76 = arith.constant 0 : index
    %c0_77 = arith.constant 0 : index
    %82 = vector.load %arg6[%c0_76, %c0_77] : memref<32x128xf32, #tpu.memory_space<vmem>>, vector<16x128xf32>
    tpu.vector_store %arg6[%c0_76, %c0_77], %81 {strides = array<i32>} : memref<32x128xf32, #tpu.memory_space<vmem>>, vector<16x128xf32>,
    %c1_78 = arith.constant 1 : index
    %c0_79 = arith.constant 0 : index
    %83 = vector.load %arg5[%c1_78, %c0_79] : memref<2x128xf32, #tpu.memory_space<vmem>>, vector<1x128xf32>
    %84 = vector.extract_strided_slice %54 {offsets = [16, 0], sizes = [16, 128], strides = [1, 1]} : vector<32x128xf32> to vector<16x128xf32>
    %85 = arith.mulf %72, %83 : vector<1x128xf32>
    %86 = vector.broadcast %85 : vector<1x128xf32> to vector<16x128xf32>
    %87 = arith.mulf %84, %86 : vector<16x128xf32>
    %c0_80 = arith.constant 0 : index
    %c0_81 = arith.constant 0 : index
    %88 = vector.load %arg4[%c0_80, %c0_81] : memref<1x128xf32, #tpu.memory_space<vmem>>, vector<1x128xf32>
    %89 = arith.mulf %88, %83 : vector<1x128xf32>
    %90 = vector.broadcast %89 : vector<1x128xf32> to vector<16x128xf32>
    %91 = arith.addf %87, %90 : vector<16x128xf32>
    %c16_82 = arith.constant 16 : index
    %c0_83 = arith.constant 0 : index
    %92 = vector.load %arg6[%c16_82, %c0_83] : memref<32x128xf32, #tpu.memory_space<vmem>>, vector<16x128xf32>
    tpu.vector_store %arg6[%c16_82, %c0_83], %91 {strides = array<i32>} : memref<32x128xf32, #tpu.memory_space<vmem>>, vector<16x128xf32>,
    return
  }
  func.func @transform_0(%arg0: i32) -> (i32, i32) {
    %c0_i32 = arith.constant 0 : i32
    %c0_i32_0 = arith.constant 0 : i32
    %c0_i32_1 = arith.constant 0 : i32
    return %c0_i32, %c0_i32_0 : i32, i32
  }
  func.func @transform_1(%arg0: i32) -> (i32, i32) {
    %c0_i32 = arith.constant 0 : i32
    %c0_i32_0 = arith.constant 0 : i32
    %c0_i32_1 = arith.constant 0 : i32
    return %c0_i32, %c0_i32_0 : i32, i32
  }
  func.func @transform_2(%arg0: i32) -> (i32, i32) {
    %c0_i32 = arith.constant 0 : i32
    %c0_i32_0 = arith.constant 0 : i32
    %c0_i32_1 = arith.constant 0 : i32
    return %c0_i32, %c0_i32_0 : i32, i32
  }
  func.func @transform_3(%arg0: i32) -> (i32, i32) {
    %c0_i32 = arith.constant 0 : i32
    %c0_i32_0 = arith.constant 0 : i32
    %c0_i32_1 = arith.constant 0 : i32
    return %c0_i32, %c0_i32_0 : i32, i32
  }
  func.func @transform_4(%arg0: i32) -> (i32, i32) {
    %c0_i32 = arith.constant 0 : i32
    %c0_i32_0 = arith.constant 0 : i32
    %c0_i32_1 = arith.constant 0 : i32
    return %c0_i32, %c0_i32_0 : i32, i32
  }
  func.func @transform_5(%arg0: i32) -> (i32, i32) {
    %c0_i32 = arith.constant 0 : i32
    %c0_i32_0 = arith.constant 0 : i32
    %c0_i32_1 = arith.constant 0 : i32
    return %c0_i32, %c0_i32_0 : i32, i32
  }
}

</mosaic_0001>

<bundles_post_ra>
// kernel: tile.9
= control target key start
LH: loop header
LB: loop body
LE: loop exit
PB: predicated region body
PF: predicated region fallthrough
CT: control target
= control target key end

     0   :  { %s7_s6 = smov 3  ;;  %s21_s9 = smov 3  ;;  %vm4_vm0 = vcmask 64512   ;;  %vm11_vm1 = vcmask 1048512   ;;  %vm18_vm2 = vcmask 982912   ;;  %vm25_vm3 = vcmask 917312   ;;  %s223_s0 = inlined_call_operand.vmem [shape: f32[2,16,8], index: 0, kind: input, shape index: {}]   ;;  %s224_s1 = inlined_call_operand.vmem [shape: f32[2,128], index: 1, kind: output, shape index: {}]  }
   0x1   :  { %v117_v0 = vld [vmem:[%s223_s0 + $0xf] ss:$16 sm:%s7_s6]   ;;  %s147_s10 = smov 120   ;;  %v119_v1 = vld [vmem:[%s223_s0 + $0xd] ss:$16 sm:%s21_s9]   ;;  %s14_s13 = smov 3 }
   0x2   :  { %9 = vrot.lane.b32.xlu0 %v117_v0, %s147_s10  ;;  %s148_s14 = smov 104   ;;  %v118_v2 = vld [vmem:[%s223_s0 + $0xe] ss:$16 sm:%s14_s13]   ;;  %s28_s17 = smov 3  ;;  %vm32_vm4 = vcmask 851712   ;;  %vm39_vm5 = vcmask 786112  }
   0x3   :  { %23 = vrot.lane.b32.xlu1 %v119_v1, %s148_s14  ;;  %v120_v3 = vld [vmem:[%s223_s0 + $0xc] ss:$16 sm:%s28_s17]   ;;  %s35_s20 = smov 3  ;;  %s42_s21 = smov 3  ;;  %vm46_vm6 = vcmask 720512   ;;  %vm53_vm7 = vcmask 654912  }
   0x4   :  { %s149_s22 = smov 112   ;;  %s150_s23 = smov 96   ;;  %v121_v4 = vld [vmem:[%s223_s0 + $0xb] ss:$16 sm:%s35_s20]   ;;  %v122_v5 = vld [vmem:[%s223_s0 + $0xa] ss:$16 sm:%s42_s21]  }
   0x5   :  { %s49_s28 = smov 3  ;;  %s56_s29 = smov 3  ;;  %vm60_vm8 = vcmask 589312   ;;  %vm67_vm9 = vcmask 523712   ;;  %vm74_vm10 = vcmask 458112   ;;  %vm81_vm11 = vcmask 392512  }
   0x6   :  { %16 = vrot.lane.b32.xlu0 %v118_v2, %s149_s22  ;;  %s151_s30 = smov 88   ;;  %s152_s2 = smov 80   ;;  %v123_v6 = vld [vmem:[%s223_s0 + $0x9] ss:$16 sm:%s49_s28]   ;;  %vm88_vm12 = vcmask 326912   ;;  %vm95_vm13 = vcmask 261312  }
   0x7   :  { %30 = vrot.lane.b32.xlu1 %v120_v3, %s150_s23  ;;  %v124_v7 = vld [vmem:[%s223_s0 + $0x8] ss:$16 sm:%s56_s29]   ;;  %s63_s7 = smov 3  ;;  %s70_s8 = smov 3  ;;  %vm102_vm14 = vcmask 195712   ;;  %vm109_vm15 = vcmask 130112  }
   0x8   :  { %s153_s9 = smov 72   ;;  %s154_s10 = smov 64   ;;  %v125_v8 = vld [vmem:[%s223_s0 + $0x7] ss:$16 sm:%s63_s7]   ;;  %v126_v9 = vld [vmem:[%s223_s0 + $0x6] ss:$16 sm:%s70_s8]  }
   0x9   :  { %s2_s13 = smov 3  ;;  %s77_s16 = smov 3 }
   0xa   :  { %37 = vrot.lane.b32.xlu0 %v121_v4, %s151_s30  ;;  %v3_v10 = vld [vmem:[%s223_s0] ss:$16 sm:%s2_s13]   ;;  %s84_s19 = smov 3  ;;  %s155_s20 = smov 56  }
   0xb   :  { %44 = vrot.lane.b32.xlu1 %v122_v5, %s152_s2  ;;  %5 = vst.msk [vmem:[#allocation0] sm:$0x3] %vm4_vm0, %v3_v10   ;;  %s156_s21 = smov 48   ;;  %v127_v11 = vld [vmem:[%s223_s0 + $0x5] ss:$16 sm:%s77_s16]   ;;  %s91_s26 = smov 3 }
   0xc   :  { %v128_v12 = vld [vmem:[%s223_s0 + $0x4] ss:$16 sm:%s84_s19]   ;;  %s98_s27 = smov 3  ;;  %s157_s28 = smov 40   ;;  %v129_v13 = vld [vmem:[%s223_s0 + $0x3] ss:$16 sm:%s91_s26]  }
   0xd   :  { %s158_s29 = smov 32   ;;  %v130_v14 = vld [vmem:[%s223_s0 + $0x2] ss:$16 sm:%s98_s27]   ;;  %s105_s5 = smov 3 }
   0xe   :  { %51 = vrot.lane.b32.xlu0 %v123_v6, %s153_s9  ;;  %s159_s6 = smov 24   ;;  %s160_s7 = smov 16   ;;  %v131_v15 = vld [vmem:[%s223_s0 + $0x1] ss:$16 sm:%s105_s5]  }
   0xf   :  { %58 = vrot.lane.b32.xlu1 %v124_v7, %s154_s10  ;;  %s161_s0 = smov 8  }
  0x12   :  { %65 = vrot.lane.b32.xlu0 %v125_v8, %s155_s20 }
  0x13   :  { %72 = vrot.lane.b32.xlu1 %v126_v9, %s156_s21 }
  0x16   :  { %79 = vrot.lane.b32.xlu0 %v127_v11, %s157_s28 }
  0x17   :  { %86 = vrot.lane.b32.xlu1 %v128_v12, %s158_s29 }
  0x1a   :  { %93 = vrot.lane.b32.xlu0 %v129_v13, %s159_s6 }
  0x1b   :  { %100 = vrot.lane.b32.xlu1 %v130_v14, %s160_s7 }
  0x1e   :  { %107 = vrot.lane.b32.xlu0 %v131_v15, %s161_s0 }
  0x74   :  { %v10_v16 = vpop.permute.xlu0 %9  }
  0x75   :  { %12 = vst.msk [vmem:[#allocation0] sm:$0x3] %vm11_vm1, %v10_v16   ;;  %v24_v17 = vpop.permute.xlu1 %23  }
  0x78   :  { %v17_v18 = vpop.permute.xlu0 %16  }
  0x79   :  { %19 = vst.msk [vmem:[#allocation0] sm:$0x3] %vm18_vm2, %v17_v18   ;;  %v31_v19 = vpop.permute.xlu1 %30  }
  0x7a   :  { %26 = vst.msk [vmem:[#allocation0] sm:$0x3] %vm25_vm3, %v24_v17  }
  0x7b   :  { %33 = vst.msk [vmem:[#allocation0] sm:$0x3] %vm32_vm4, %v31_v19  }
  0x7c   :  { %v38_v20 = vpop.permute.xlu0 %37  }
  0x7d   :  { %40 = vst.msk [vmem:[#allocation0] sm:$0x3] %vm39_vm5, %v38_v20   ;;  %v45_v21 = vpop.permute.xlu1 %44  }
  0x7e   :  { %47 = vst.msk [vmem:[#allocation0] sm:$0x3] %vm46_vm6, %v45_v21  }
  0x80   :  { %v52_v22 = vpop.permute.xlu0 %51  }
  0x81   :  { %54 = vst.msk [vmem:[#allocation0] sm:$0x3] %vm53_vm7, %v52_v22   ;;  %v59_v23 = vpop.permute.xlu1 %58  }
  0x82   :  { %61 = vst.msk [vmem:[#allocation0] sm:$0x3] %vm60_vm8, %v59_v23  }
  0x84   :  { %v66_v24 = vpop.permute.xlu0 %65  }
  0x85   :  { %68 = vst.msk [vmem:[#allocation0] sm:$0x3] %vm67_vm9, %v66_v24   ;;  %v73_v25 = vpop.permute.xlu1 %72  }
  0x86   :  { %75 = vst.msk [vmem:[#allocation0] sm:$0x3] %vm74_vm10, %v73_v25  }
  0x88   :  { %v80_v26 = vpop.permute.xlu0 %79  }
  0x89   :  { %82 = vst.msk [vmem:[#allocation0] sm:$0x3] %vm81_vm11, %v80_v26   ;;  %v87_v27 = vpop.permute.xlu1 %86  }
  0x8a   :  { %89 = vst.msk [vmem:[#allocation0] sm:$0x3] %vm88_vm12, %v87_v27  }
  0x8c   :  { %v94_v28 = vpop.permute.xlu0 %93  }
  0x8d   :  { %96 = vst.msk [vmem:[#allocation0] sm:$0x3] %vm95_vm13, %v94_v28   ;;  %v101_v29 = vpop.permute.xlu1 %100  }
  0x8e   :  { %103 = vst.msk [vmem:[#allocation0] sm:$0x3] %vm102_vm14, %v101_v29  }
  0x90   :  { %v108_v30 = vpop.permute.xlu0 %107  }
  0x91   :  { %110 = vst.msk [vmem:[#allocation0] sm:$0x3] %vm109_vm15, %v108_v30  }
  0x98   :  { %v114_v31 = vld [vmem:[#allocation0] sm:$0x3] }
  0x99   :  { %116 = vst [vmem:[%s224_s1] sm:$0x3] %v114_v31 }

// kernel: gated_conv_bn.1
= control target key start
LH: loop header
LB: loop body
LE: loop exit
PB: predicated region body
PF: predicated region fallthrough
CT: control target
= control target key end

     0   :  { %vm27_vm0 = vcmask 523264   ;;  %s942_s22 = smov 120   ;;  %s943_s23 = smov 60   ;;  %vm20_vm1 = vcmask 1048064   ;;  %s1405_s0 = inlined_call_operand.vmem [shape: f32[36,72], index: 0, kind: input, shape index: {}]   ;;  %s1406_s1 = inlined_call_operand.vmem [shape: f32[640,128], index: 1, kind: input, shape index: {}]   ;;  %s1407_s2 = inlined_call_operand.vmem [shape: f32[1,128], index: 2, kind: input, shape index: {}]   ;;  %s1408_s3 = inlined_call_operand.vmem [shape: f32[1,128], index: 3, kind: input, shape index: {}]   ;;  %s1409_s4 = inlined_call_operand.vmem [shape: f32[2,128], index: 4, kind: input, shape index: {}]   ;;  %s1410_s5 = inlined_call_operand.vmem [shape: f32[32,128], index: 5, kind: output, shape index: {}]  }
   0x1   :  { %v42_v0 = vld [vmem:[%s1405_s0] sm:$0xff]  ;;  %v994_v2 = vld [vmem:[%s1405_s0 + $0x8] sm:$0xff]  ;;  %v1010_v5 = vld [vmem:[%s1405_s0 + $0x12] sm:$0xff]  ;;  %s944_s17 = smov 64   ;;  %s945_s18 = smov 124  }
   0x2   :  { %v987_v1 = vld [vmem:[%s1405_s0 + $0x2] sm:$0xff]  ;;  %46 = vrot.lane.b32.xlu0 %v42_v0, %s942_s22  ;;  %34 = vrot.lane.b32.xlu1 %v42_v0, %s943_s23  ;;  %28 = vst.msk [vmem:[#allocation2] sm:$0xff] %vm27_vm0, %v42_v0  ;;  %v1005_v4 = vld [vmem:[%s1405_s0 + $0xa] sm:$0xff]  ;;  %29 = vst.msk [vmem:[#allocation2 + $0x28] sm:$0xff] %vm27_vm0, %v994_v2  ;;  %s946_s24 = smov 56  }
   0x3   :  { %92 = vst.msk [vmem:[#allocation2 + $0x18] sm:$0xff] %vm27_vm0, %v987_v1  ;;  %v54_v3 = vld [vmem:[%s1405_s0 + $0x1] sm:$0xff]  ;;  %v1017_v6 = vld [vmem:[%s1405_s0 + $0x14] sm:$0xff]  ;;  %93 = vst.msk [vmem:[#allocation2 + $0x40] sm:$0xff] %vm27_vm0, %v1005_v4 }
   0x4   :  { %v1022_v7 = vld [vmem:[%s1405_s0 + $0x1a] sm:$0xff]  ;;  %120 = vst.msk [vmem:[#allocation2 + $0x50] sm:$0xff] %vm27_vm0, %v1010_v5  ;;  %v247_v10 = vld [vmem:[%s1406_s1 + $0x88] sm:$0xff]  ;;  %184 = vst.msk [vmem:[#allocation2 + $0x68] sm:$0xff] %vm27_vm0, %v1017_v6 }
   0x5   :  { %v1031_v8 = vld [vmem:[%s1405_s0 + $0x1c] sm:$0xff]  ;;  %121 = vst.msk [vmem:[#allocation2 + $0x78] sm:$0xff] %vm27_vm0, %v1022_v7  ;;  %v231_v13 = vld [vmem:[%s1406_s1 + $0x8] sm:$0xff]  ;;  %v248_v15 = vld [vmem:[%s1406_s1 + $0x90] sm:$0xff] }
   0x6   :  { %v246_v9 = vld [vmem:[%s1406_s1 + $0x80] sm:$0xff]  ;;  %58 = vrot.lane.b32.xlu0 %v54_v3, %s944_s17  ;;  %70 = vrot.lane.b32.xlu1 %v54_v3, %s945_s18  ;;  %185 = vst.msk [vmem:[#allocation2 + $0x90] sm:$0xff] %vm27_vm0, %v1031_v8  ;;  %v249_v16 = vld [vmem:[%s1406_s1 + $0x98] sm:$0xff] }
   0x7   :  { %v819_v11 = vpack.c.bf16 %v247_v10, %v246_v9  ;;  %v230_v12 = vld [vmem:[%s1406_s1] sm:$0xff]  ;;  %v823_v18 = vpack.c.bf16 %v249_v16, %v248_v15  ;;  %v279_v19 = vld [vmem:[%s1406_s1 + $0x188] sm:$0xff]  ;;  %v232_v20 = vld [vmem:[%s1406_s1 + $0x10] sm:$0xff] }
   0x8   :  { %v821_v14 = vpack.c.bf16 %v231_v13, %v230_v12  ;;  %v278_v17 = vld [vmem:[%s1406_s1 + $0x180] sm:$0xff]  ;;  %v233_v21 = vld [vmem:[%s1406_s1 + $0x18] sm:$0xff]  ;;  %v1074_v22 = vld [vmem:[%s1405_s0 + $0x9] sm:$0xff] }
   0x9   :  { %820 = vmatprep.subr.bf16.mxu0 %v819_v11  ;;  %v851_v23 = vpack.c.bf16 %v279_v19, %v278_v17  ;;  %v825_v24 = vpack.c.bf16 %v233_v21, %v232_v20  ;;  %v262_v25 = vld [vmem:[%s1406_s1 + $0x100] sm:$0xff]  ;;  %v263_v26 = vld [vmem:[%s1406_s1 + $0x108] sm:$0xff]  ;;  %v280_v30 = vld [vmem:[%s1406_s1 + $0x190] sm:$0xff] }
   0xa   :  { %822 = vmatpush3.bf16.msra.mxu0 %v821_v14  ;;  %v250_v27 = vld [vmem:[%s1406_s1 + $0xa0] sm:$0xff]  ;;  %98 = vrot.lane.b32.xlu0 %v987_v1, %s943_s23  ;;  %v853_v28 = vpack.c.bf16 %v263_v26, %v262_v25  ;;  %v251_v29 = vld [vmem:[%s1406_s1 + $0xa8] sm:$0xff]  ;;  %v281_v32 = vld [vmem:[%s1406_s1 + $0x198] sm:$0xff] }
   0xb   :  { %82 = vrot.lane.b32.xlu1 %v54_v3, %s946_s24  ;;  %824 = vmatprep.subr.bf16.mxu0 %v823_v18  ;;  %v827_v31 = vpack.c.bf16 %v251_v29, %v250_v27  ;;  %v234_v33 = vld [vmem:[%s1406_s1 + $0x20] sm:$0xff]  ;;  %v235_v34 = vld [vmem:[%s1406_s1 + $0x28] sm:$0xff]  ;;  %v855_v35 = vpack.c.bf16 %v281_v32, %v280_v30  ;;  %v264_v36 = vld [vmem:[%s1406_s1 + $0x110] sm:$0xff] }
   0xc   :  { %852 = vmatprep.subr.bf16.mxu1 %v851_v23  ;;  %v265_v37 = vld [vmem:[%s1406_s1 + $0x118] sm:$0xff]  ;;  %v252_v38 = vld [vmem:[%s1406_s1 + $0xb0] sm:$0xff]  ;;  %v829_v39 = vpack.c.bf16 %v235_v34, %v234_v33  ;;  %v282_v42 = vld [vmem:[%s1406_s1 + $0x1a0] sm:$0xff] }
   0xd   :  { %854 = vmatpush3.bf16.msra.mxu1 %v853_v28  ;;  %v857_v40 = vpack.c.bf16 %v265_v37, %v264_v36  ;;  %v253_v41 = vld [vmem:[%s1406_s1 + $0xb8] sm:$0xff]  ;;  %v283_v43 = vld [vmem:[%s1406_s1 + $0x1a8] sm:$0xff]  ;;  %v236_v45 = vld [vmem:[%s1406_s1 + $0x30] sm:$0xff] }
   0xe   :  { %826 = vmatpush3.bf16.msra.mxu0 %v825_v24  ;;  %48 = vrot.lane.b32.xlu0 %v994_v2, %s942_s22  ;;  %v859_v44 = vpack.c.bf16 %v283_v43, %v282_v42  ;;  %v237_v46 = vld [vmem:[%s1406_s1 + $0x38] sm:$0xff]  ;;  %v831_v47 = vpack.c.bf16 %v253_v41, %v252_v38  ;;  %v266_v48 = vld [vmem:[%s1406_s1 + $0x120] sm:$0xff]  ;;  %v267_v49 = vld [vmem:[%s1406_s1 + $0x128] sm:$0xff] }
   0xf   :  { %60 = vrot.lane.b32.xlu1 %v1074_v22, %s944_s17  ;;  %828 = vmatprep.subr.bf16.mxu0 %v827_v31  ;;  %v254_v50 = vld [vmem:[%s1406_s1 + $0xc0] sm:$0xff]  ;;  %v861_v51 = vpack.c.bf16 %v267_v49, %v266_v48  ;;  %v255_v52 = vld [vmem:[%s1406_s1 + $0xc8] sm:$0xff]  ;;  %v284_v53 = vld [vmem:[%s1406_s1 + $0x1b0] sm:$0xff]  ;;  %v833_v55 = vpack.c.bf16 %v237_v46, %v236_v45  ;;  %v947_v49 = vmov 0.0  }
  0x10   :  { %856 = vmatprep.subr.bf16.mxu1 %v855_v35  ;;  %v285_v54 = vld [vmem:[%s1406_s1 + $0x1b8] sm:$0xff]  ;;  %v238_v57 = vld [vmem:[%s1406_s1 + $0x40] sm:$0xff]  ;;  %v268_v58 = vld [vmem:[%s1406_s1 + $0x130] sm:$0xff]  ;;  %v835_v61 = vpack.c.bf16 %v255_v52, %v254_v50  ;;  %21 = vst.msk [vmem:[#allocation2 + $0x20] sm:$0xff] %vm20_vm1, %v947_v49 }
  0x11   :  { %858 = vmatpush3.bf16.msra.mxu1 %v857_v40  ;;  %v863_v56 = vpack.c.bf16 %v285_v54, %v284_v53  ;;  %v239_v59 = vld [vmem:[%s1406_s1 + $0x48] sm:$0xff]  ;;  %v269_v60 = vld [vmem:[%s1406_s1 + $0x138] sm:$0xff]  ;;  %v286_v62 = vld [vmem:[%s1406_s1 + $0x1c0] sm:$0xff]  ;;  %22 = vst.msk [vmem:[#allocation2 + $0x48] sm:$0xff] %vm20_vm1, %v947_v49 }
  0x12   :  { %830 = vmatpush3.bf16.msra.mxu0 %v829_v39  ;;  %860 = vmatprep.subr.bf16.mxu1 %v859_v44  ;;  %v287_v63 = vld [vmem:[%s1406_s1 + $0x1c8] sm:$0xff]  ;;  %v865_v0 = vpack.c.bf16 %v269_v60, %v268_v58  ;;  %v257_v3 = vld [vmem:[%s1406_s1 + $0xd8] sm:$0xff]  ;;  %v240_v9 = vld [vmem:[%s1406_s1 + $0x50] sm:$0xff]  ;;  %v837_v10 = vpack.c.bf16 %v239_v59, %v238_v57  ;;  %23 = vst.msk [vmem:[#allocation2 + $0x70] sm:$0xff] %vm20_vm1, %v947_v49 }
  0x13   :  { %36 = vrot.lane.b32.xlu0 %v994_v2, %s943_s23  ;;  %72 = vrot.lane.b32.xlu1 %v1074_v22, %s945_s18  ;;  %v256_v2 = vld [vmem:[%s1406_s1 + $0xd0] sm:$0xff]  ;;  %v867_v11 = vpack.c.bf16 %v287_v63, %v286_v62  ;;  %v241_v12 = vld [vmem:[%s1406_s1 + $0x58] sm:$0xff]  ;;  %24 = vst.msk [vmem:[#allocation2 + $0x98] sm:$0xff] %vm20_vm1, %v947_v49 }
  0x14   :  { %832 = vmatprep.subr.bf16.mxu0 %v831_v47  ;;  %v270_v13 = vld [vmem:[%s1406_s1 + $0x140] sm:$0xff]  ;;  %v271_v14 = vld [vmem:[%s1406_s1 + $0x148] sm:$0xff]  ;;  %v288_v15 = vld [vmem:[%s1406_s1 + $0x1d0] sm:$0xff]  ;;  %v839_v18 = vpack.c.bf16 %v257_v3, %v256_v2  ;;  %v841_v23 = vpack.c.bf16 %v241_v12, %v240_v9 }
  0x15   :  { %862 = vmatpush3.bf16.msra.mxu1 %v861_v51  ;;  %v289_v16 = vld [vmem:[%s1406_s1 + $0x1d8] sm:$0xff]  ;;  %v869_v19 = vpack.c.bf16 %v271_v14, %v270_v13  ;;  %v258_v20 = vld [vmem:[%s1406_s1 + $0xe0] sm:$0xff]  ;;  %v259_v21 = vld [vmem:[%s1406_s1 + $0xe8] sm:$0xff] }
  0x16   :  { %834 = vmatpush3.bf16.msra.mxu0 %v833_v55  ;;  %864 = vmatprep.subr.bf16.mxu1 %v863_v56  ;;  %v1202_v17 = vld [vmem:[%s1405_s0 + $0x13] sm:$0xff]  ;;  %v871_v24 = vpack.c.bf16 %v289_v16, %v288_v15  ;;  %v243_v25 = vld [vmem:[%s1406_s1 + $0x68] sm:$0xff]  ;;  %v290_v28 = vld [vmem:[%s1406_s1 + $0x1e0] sm:$0xff]  ;;  %v843_v30 = vpack.c.bf16 %v259_v21, %v258_v20 }
  0x17   :  { %100 = vrot.lane.b32.xlu0 %v1005_v4, %s943_s23  ;;  %84 = vrot.lane.b32.xlu1 %v1074_v22, %s946_s24  ;;  %v242_v22 = vld [vmem:[%s1406_s1 + $0x60] sm:$0xff]  ;;  %v272_v26 = vld [vmem:[%s1406_s1 + $0x150] sm:$0xff] }
  0x18   :  { %836 = vmatprep.subr.bf16.mxu0 %v835_v61  ;;  %v273_v27 = vld [vmem:[%s1406_s1 + $0x158] sm:$0xff]  ;;  %v291_v29 = vld [vmem:[%s1406_s1 + $0x1e8] sm:$0xff]  ;;  %v260_v32 = vld [vmem:[%s1406_s1 + $0xf0] sm:$0xff]  ;;  %v845_v35 = vpack.c.bf16 %v243_v25, %v242_v22 }
  0x19   :  { %866 = vmatpush3.bf16.msra.mxu1 %v865_v0  ;;  %v873_v31 = vpack.c.bf16 %v273_v27, %v272_v26  ;;  %v261_v33 = vld [vmem:[%s1406_s1 + $0xf8] sm:$0xff]  ;;  %v244_v34 = vld [vmem:[%s1406_s1 + $0x70] sm:$0xff]  ;;  %v875_v36 = vpack.c.bf16 %v291_v29, %v290_v28  ;;  %v274_v38 = vld [vmem:[%s1406_s1 + $0x160] sm:$0xff] }
  0x1a   :  { %838 = vmatpush3.bf16.msra.mxu0 %v837_v10  ;;  %868 = vmatprep.subr.bf16.mxu1 %v867_v11  ;;  %v245_v37 = vld [vmem:[%s1406_s1 + $0x78] sm:$0xff]  ;;  %v275_v39 = vld [vmem:[%s1406_s1 + $0x168] sm:$0xff]  ;;  %v292_v40 = vld [vmem:[%s1406_s1 + $0x1f0] sm:$0xff]  ;;  %v847_v42 = vpack.c.bf16 %v261_v33, %v260_v32 }
  0x1b   :  { %138 = vrot.lane.b32.xlu0 %v1010_v5, %s942_s22  ;;  %150 = vrot.lane.b32.xlu1 %v1202_v17, %s944_s17  ;;  %v293_v41 = vld [vmem:[%s1406_s1 + $0x1f8] sm:$0xff]  ;;  %v877_v43 = vpack.c.bf16 %v275_v39, %v274_v38  ;;  %v294_v44 = vld [vmem:[%s1406_s1 + $0x200] sm:$0xff]  ;;  %v849_v45 = vpack.c.bf16 %v245_v37, %v244_v34 }
  0x1c   :  { %840 = vmatprep.subr.bf16.mxu0 %v839_v18  ;;  %v879_v46 = vpack.c.bf16 %v293_v41, %v292_v40  ;;  %v276_v47 = vld [vmem:[%s1406_s1 + $0x170] sm:$0xff]  ;;  %v277_v48 = vld [vmem:[%s1406_s1 + $0x178] sm:$0xff]  ;;  %v298_v61 = vld [vmem:[%s1406_s1 + $0x220] sm:$0xff] }
  0x1d   :  { %870 = vmatpush3.bf16.msra.mxu1 %v869_v19  ;;  %v147_v50 = vld [vmem:[%s1405_s0 + $0x1b] sm:$0xff]  ;;  %v881_v52 = vpack.c.bf16 %v277_v48, %v276_v47  ;;  %v299_v62 = vld [vmem:[%s1406_s1 + $0x228] sm:$0xff]  ;;  %v300_v10 = vld [vmem:[%s1406_s1 + $0x230] sm:$0xff] }
  0x1e   :  { %842 = vmatpush3.bf16.msra.mxu0 %v841_v23  ;;  %872 = vmatprep.subr.bf16.mxu1 %v871_v24  ;;  %v891_v9 = vpack.c.bf16 %v299_v62, %v298_v61  ;;  %v301_v11 = vld [vmem:[%s1406_s1 + $0x238] sm:$0xff]  ;;  %v302_v16 = vld [vmem:[%s1406_s1 + $0x240] sm:$0xff]  ;;  %v304_v22 = vld [vmem:[%s1406_s1 + $0x250] sm:$0xff] }
  0x1f   :  { %126 = vrot.lane.b32.xlu0 %v1010_v5, %s943_s23  ;;  %162 = vrot.lane.b32.xlu1 %v1202_v17, %s945_s18  ;;  %v295_v5 = vld [vmem:[%s1406_s1 + $0x208] sm:$0xff]  ;;  %v895_v14 = vpack.c.bf16 %v301_v11, %v300_v10  ;;  %v305_v23 = vld [vmem:[%s1406_s1 + $0x258] sm:$0xff] }
  0x20   :  { %844 = vmatprep.subr.bf16.mxu0 %v843_v30  ;;  %v883_v51 = vpack.c.bf16 %v295_v5, %v294_v44  ;;  %v903_v28 = vpack.c.bf16 %v305_v23, %v304_v22  ;;  %v306_v29 = vld [vmem:[%s1406_s1 + $0x260] sm:$0xff]  ;;  %v307_v30 = vld [vmem:[%s1406_s1 + $0x268] sm:$0xff] }
  0x21   :  { %874 = vmatpush3.bf16.msra.mxu1 %v873_v31  ;;  %v907_v33 = vpack.c.bf16 %v307_v30, %v306_v29 }
  0x22   :  { %846 = vmatpush3.bf16.msra.mxu0 %v845_v35  ;;  %876 = vmatprep.subr.bf16.mxu1 %v875_v36  ;;  %v308_v35 = vld [vmem:[%s1406_s1 + $0x270] sm:$0xff]  ;;  %v309_v36 = vld [vmem:[%s1406_s1 + $0x278] sm:$0xff] }
  0x23   :  { %190 = vrot.lane.b32.xlu0 %v1017_v6, %s943_s23  ;;  %140 = vrot.lane.b32.xlu1 %v1022_v7, %s942_s22  ;;  %v911_v40 = vpack.c.bf16 %v309_v36, %v308_v35 }
  0x24   :  { %848 = vmatprep.subr.bf16.mxu0 %v847_v42 }
  0x25   :  { %878 = vmatpush3.bf16.msra.mxu1 %v877_v43 }
  0x26   :  { %850 = vmatpush3.bf16.msra.mxu0 %v849_v45  ;;  %880 = vmatprep.subr.bf16.mxu1 %v879_v46 }
  0x27   :  { %174 = vrot.lane.b32.xlu0 %v1202_v17, %s946_s24  ;;  %152 = vrot.lane.b32.xlu1 %v147_v50, %s944_s17  ;;  %v303_v17 = vld [vmem:[%s1406_s1 + $0x248] sm:$0xff] }
  0x28   :  { %884 = vmatprep.subr.bf16.mxu0 %v883_v51  ;;  %v899_v21 = vpack.c.bf16 %v303_v17, %v302_v16 }
  0x29   :  { %882 = vmatpush3.bf16.msra.mxu1 %v881_v52 }
  0x2a   :  { %915 = vmatprep.subr.bf16.mxu1 %v883_v51 }
  0x2b   :  { %128 = vrot.lane.b32.xlu0 %v1022_v7, %s943_s23  ;;  %164 = vrot.lane.b32.xlu1 %v147_v50, %s945_s18  ;;  %s949_s18 = smov 16  }
  0x2f   :  { %192 = vrot.lane.b32.xlu0 %v1031_v8, %s943_s23  ;;  %176 = vrot.lane.b32.xlu1 %v147_v50, %s946_s24  ;;  %s950_s24 = smov 32  }
  0x33   :  { %110 = vrot.lane.b32.xlu0 %v987_v1, %s942_s22  ;;  %112 = vrot.lane.b32.xlu1 %v1005_v4, %s942_s22 }
  0x37   :  { %202 = vrot.lane.b32.xlu0 %v1017_v6, %s942_s22  ;;  %204 = vrot.lane.b32.xlu1 %v1031_v8, %s942_s22  ;;  %v296_v6 = vld [vmem:[%s1406_s1 + $0x210] sm:$0xff]  ;;  %v297_v8 = vld [vmem:[%s1406_s1 + $0x218] sm:$0xff]  ;;  %s948_s1 = smov 8  }
  0x38   :  { %v887_v59 = vpack.c.bf16 %v297_v8, %v296_v6 }
  0x74   :  { %v47_v7 = vpop.permute.xlu0 %46  ;;  %v35_v53 = vpop.permute.xlu1 %34 }
  0x75   :  { %52 = vst.msk [vmem:[#allocation2 + $0x8] sm:$0xff] %vm27_vm0, %v47_v7 }
  0x76   :  { %40 = vst.msk [vmem:[#allocation2] sm:$0xff] %vm20_vm1, %v35_v53 }
  0x78   :  { %v59_v54 = vpop.permute.xlu0 %58  ;;  %v71_v55 = vpop.permute.xlu1 %70 }
  0x79   :  { %64 = vst.msk [vmem:[#allocation2 + $0x8] sm:$0xff] %vm20_vm1, %v59_v54 }
  0x7a   :  { %76 = vst.msk [vmem:[#allocation2 + $0x10] sm:$0xff] %vm27_vm0, %v71_v55 }
  0x7c   :  { %v99_v1 = vpop.permute.xlu0 %98 }
  0x7d   :  { %v83_v4 = vpop.permute.xlu1 %82  ;;  %104 = vst.msk [vmem:[#allocation2 + $0x18] sm:$0xff] %vm20_vm1, %v99_v1  ;;  %v210_v60 = vld [vmem:[#allocation2] sm:$0xff] }
  0x7e   :  { %88 = vst.msk [vmem:[#allocation2 + $0x10] sm:$0xff] %vm20_vm1, %v83_v4 }
  0x80   :  { %v49_v56 = vpop.permute.xlu0 %48  ;;  %v211_v57 = vld [vmem:[#allocation2 + $0x8] sm:$0xff] }
  0x81   :  { %v61_v58 = vpop.permute.xlu1 %60  ;;  %53 = vst.msk [vmem:[#allocation2 + $0x30] sm:$0xff] %vm27_vm0, %v49_v56  ;;  %374 = vmatprep.mubr.f32.mxu0 %v211_v57 }
  0x82   :  { %65 = vst.msk [vmem:[#allocation2 + $0x30] sm:$0xff] %vm20_vm1, %v61_v58  ;;  %375 = vmatmul.mubr.f32.vlgmr.msra.gmra.mrb[0].mxu0 %v210_v60 }
  0x83   :  { %886 = vmatpush3.bf16.msra.mxu0 %v883_v51 }
  0x84   :  { %v213_v0 = vld [vmem:[#allocation2 + $0x18] sm:$0xff]  ;;  %888 = vmatprep.subr.bf16.mxu0 %v887_v59 }
  0x85   :  { %v37_v63 = vpop.permute.xlu0 %36  ;;  %v73_v2 = vpop.permute.xlu1 %72  ;;  %v212_v3 = vld [vmem:[#allocation2 + $0x10] sm:$0xff]  ;;  %459 = vmatprep.mubr.f32.mxu1 %v213_v0 }
  0x86   :  { %41 = vst.msk [vmem:[#allocation2 + $0x28] sm:$0xff] %vm20_vm1, %v37_v63  ;;  %460 = vmatmul.mubr.f32.vlgmr.msra.gmra.mrb[0].mxu1 %v212_v3 }
  0x87   :  { %77 = vst.msk [vmem:[#allocation2 + $0x38] sm:$0xff] %vm27_vm0, %v73_v2  ;;  %923 = vmatpush3.bf16.msra.mxu1 %v883_v51  ;;  %890 = vmatpush3.bf16.msra.mxu0 %v887_v59 }
  0x88   :  { %916 = vmatprep.subr.bf16.mxu1 %v887_v59  ;;  %892 = vmatprep.subr.bf16.mxu0 %v891_v9 }
  0x89   :  { %v101_v12 = vpop.permute.xlu0 %100  ;;  %v85_v13 = vpop.permute.xlu1 %84  ;;  %v216_v15 = vld [vmem:[#allocation2 + $0x30] sm:$0xff] }
  0x8a   :  { %105 = vst.msk [vmem:[#allocation2 + $0x40] sm:$0xff] %vm20_vm1, %v101_v12  ;;  %89 = vst.msk [vmem:[#allocation2 + $0x38] sm:$0xff] %vm20_vm1, %v85_v13  ;;  %379 = vmatprep.mubr.f32.mxu0 %v216_v15 }
  0x8b   :  { %924 = vmatpush3.bf16.msra.mxu1 %v887_v59  ;;  %894 = vmatpush3.bf16.msra.mxu0 %v891_v9 }
  0x8c   :  { %917 = vmatprep.subr.bf16.mxu1 %v891_v9  ;;  %896 = vmatprep.subr.bf16.mxu0 %v895_v14 }
  0x8d   :  { %v139_v18 = vpop.permute.xlu0 %138  ;;  %v151_v19 = vpop.permute.xlu1 %150  ;;  %v215_v20 = vld [vmem:[#allocation2 + $0x28] sm:$0xff] }
  0x8e   :  { %144 = vst.msk [vmem:[#allocation2 + $0x58] sm:$0xff] %vm27_vm0, %v139_v18  ;;  %380 = vmatmul.mubr.f32.gmra.mrb[2].mxu0 %v215_v20 }
  0x8f   :  { %156 = vst.msk [vmem:[#allocation2 + $0x58] sm:$0xff] %vm20_vm1, %v151_v19  ;;  %925 = vmatpush3.bf16.msra.mxu1 %v891_v9  ;;  %898 = vmatpush3.bf16.msra.mxu0 %v895_v14 }
  0x90   :  { %918 = vmatprep.subr.bf16.mxu1 %v895_v14  ;;  %900 = vmatprep.subr.bf16.mxu0 %v899_v21 }
  0x91   :  { %v127_v24 = vpop.permute.xlu0 %126  ;;  %v218_v25 = vld [vmem:[#allocation2 + $0x40] sm:$0xff]  ;;  %v163_v26 = vpop.permute.xlu1 %162  ;;  %v217_v27 = vld [vmem:[#allocation2 + $0x38] sm:$0xff] }
  0x92   :  { %132 = vst.msk [vmem:[#allocation2 + $0x50] sm:$0xff] %vm20_vm1, %v127_v24  ;;  %464 = vmatprep.mubr.f32.mxu1 %v218_v25 }
  0x93   :  { %168 = vst.msk [vmem:[#allocation2 + $0x60] sm:$0xff] %vm27_vm0, %v163_v26  ;;  %465 = vmatmul.mubr.f32.gmra.mrb[2].mxu1 %v217_v27  ;;  %902 = vmatpush3.bf16.msra.mxu0 %v899_v21 }
  0x94   :  { %926 = vmatpush3.bf16.msra.mxu1 %v895_v14  ;;  %904 = vmatprep.subr.bf16.mxu0 %v903_v28 }
  0x95   :  { %v191_v31 = vpop.permute.xlu0 %190  ;;  %v141_v32 = vpop.permute.xlu1 %140  ;;  %919 = vmatprep.subr.bf16.mxu1 %v899_v21 }
  0x96   :  { %196 = vst.msk [vmem:[#allocation2 + $0x68] sm:$0xff] %vm20_vm1, %v191_v31  ;;  %v221_v34 = vld [vmem:[#allocation2 + $0x58] sm:$0xff] }
  0x97   :  { %145 = vst.msk [vmem:[#allocation2 + $0x80] sm:$0xff] %vm27_vm0, %v141_v32  ;;  %384 = vmatprep.mubr.f32.mxu0 %v221_v34  ;;  %906 = vmatpush3.bf16.msra.mxu0 %v903_v28 }
  0x98   :  { %927 = vmatpush3.bf16.msra.mxu1 %v899_v21  ;;  %908 = vmatprep.subr.bf16.mxu0 %v907_v33 }
  0x99   :  { %v175_v37 = vpop.permute.xlu0 %174  ;;  %v153_v38 = vpop.permute.xlu1 %152  ;;  %v220_v39 = vld [vmem:[#allocation2 + $0x50] sm:$0xff]  ;;  %920 = vmatprep.subr.bf16.mxu1 %v903_v28 }
  0x9a   :  { %180 = vst.msk [vmem:[#allocation2 + $0x60] sm:$0xff] %vm20_vm1, %v175_v37  ;;  %157 = vst.msk [vmem:[#allocation2 + $0x80] sm:$0xff] %vm20_vm1, %v153_v38  ;;  %385 = vmatmul.mubr.f32.gmra.mrb[4].mxu0 %v220_v39 }
  0x9b   :  { %910 = vmatpush3.bf16.msra.mxu0 %v907_v33 }
  0x9c   :  { %928 = vmatpush3.bf16.msra.mxu1 %v903_v28  ;;  %912 = vmatprep.subr.bf16.mxu0 %v911_v40 }
  0x9d   :  { %v129_v41 = vpop.permute.xlu0 %128  ;;  %v223_v42 = vld [vmem:[#allocation2 + $0x68] sm:$0xff]  ;;  %v165_v43 = vpop.permute.xlu1 %164  ;;  %921 = vmatprep.subr.bf16.mxu1 %v907_v33 }
  0x9e   :  { %133 = vst.msk [vmem:[#allocation2 + $0x78] sm:$0xff] %vm20_vm1, %v129_v41  ;;  %469 = vmatprep.mubr.f32.mxu1 %v223_v42 }
  0x9f   :  { %169 = vst.msk [vmem:[#allocation2 + $0x88] sm:$0xff] %vm27_vm0, %v165_v43  ;;  %914 = vmatpush3.bf16.msra.mxu0 %v911_v40 }
  0xa0   :  { %929 = vmatpush3.bf16.msra.mxu1 %v907_v33 }
  0xa1   :  { %v193_v44 = vpop.permute.xlu0 %192  ;;  %v222_v5 = vld [vmem:[#allocation2 + $0x60] sm:$0xff]  ;;  %v177_v45 = vpop.permute.xlu1 %176  ;;  %922 = vmatprep.subr.bf16.mxu1 %v911_v40 }
  0xa2   :  { %v226_v46 = vld [vmem:[#allocation2 + $0x80] sm:$0xff]  ;;  %197 = vst.msk [vmem:[#allocation2 + $0x90] sm:$0xff] %vm20_vm1, %v193_v44  ;;  %470 = vmatmul.mubr.f32.gmra.mrb[4].mxu1 %v222_v5  ;;  %181 = vst.msk [vmem:[#allocation2 + $0x88] sm:$0xff] %vm20_vm1, %v177_v45  ;;  %v587_v45 = vlaneseq }
  0xa3   :  { %389 = vmatprep.mubr.f32.mxu0 %v226_v46 }
  0xa4   :  { %930 = vmatpush3.bf16.msra.mxu1 %v911_v40  ;;  %v588_v46 = vshrl.u32 %v587_v45, 7 }
  0xa5   :  { %v111_v47 = vpop.permute.xlu0 %110  ;;  %v113_v48 = vpop.permute.xlu1 %112  ;;  %v225_v49 = vld [vmem:[#allocation2 + $0x78] sm:$0xff] }
  0xa6   :  { %116 = vst.msk [vmem:[#allocation2 + $0x20] sm:$0xff] %vm27_vm0, %v111_v47  ;;  %117 = vst.msk [vmem:[#allocation2 + $0x48] sm:$0xff] %vm27_vm0, %v113_v48  ;;  %390 = vmatmul.mubr.f32.gmra.mrb[6].mxu0 %v225_v49  ;;  %v589_v48 = vsub.s32 0, %v588_v46 }
  0xa9   :  { %v203_v50 = vpop.permute.xlu0 %202  ;;  %v228_v51 = vld [vmem:[#allocation2 + $0x90] sm:$0xff]  ;;  %v205_v52 = vpop.permute.xlu1 %204  ;;  %v227_v7 = vld [vmem:[#allocation2 + $0x88] sm:$0xff] }
  0xaa   :  { %208 = vst.msk [vmem:[#allocation2 + $0x70] sm:$0xff] %vm27_vm0, %v203_v50  ;;  %474 = vmatprep.mubr.f32.mxu1 %v228_v51  ;;  %209 = vst.msk [vmem:[#allocation2 + $0x98] sm:$0xff] %vm27_vm0, %v205_v52 }
  0xab   :  { %475 = vmatmul.mubr.f32.gmra.mrb[6].mxu1 %v227_v7 }
  0xad   :  { %v214_v53 = vld [vmem:[#allocation2 + $0x20] sm:$0xff]  ;;  %v219_v54 = vld [vmem:[#allocation2 + $0x48] sm:$0xff] }
  0xae   :  { %813 = vmatprep.mubr.f32.mxu0 %v214_v53 }
  0xaf   :  { %814 = vmatmul.mubr.f32.vlgmr.msra.gmra.mrb[8].mxu0 %v219_v54 }
  0xb1   :  { %v224_v55 = vld [vmem:[#allocation2 + $0x70] sm:$0xff]  ;;  %v229_v1 = vld [vmem:[#allocation2 + $0x98] sm:$0xff] }
  0xb2   :  { %816 = vmatprep.mubr.f32.mxu1 %v224_v55 }
  0xb3   :  { %817 = vmatmul.mubr.f32.vlgmr.msra.gmra.mrb[8].mxu1 %v229_v1 }
 0x155   :  { %v705_v4 = vpop.f32.mrb[0].mxu0 }
 0x156   :  { %v706_v6 = vpop.f32.mrb[1].mxu0 }
 0x157   :  { %v707_v8 = vadd.f32 %v706_v6, %v705_v4 }
 0x159   :  { %v749_v56 = vpop.f32.mrb[0].mxu1 }
 0x15a   :  { %v750_v57 = vpop.f32.mrb[1].mxu1 }
 0x15b   :  { %v751_v58 = vadd.f32 %v750_v57, %v749_v56 }
 0x15d   :  { %v462_v59 = vadd.f32 %v751_v58, %v707_v8 }
 0x161   :  { %v708_v60 = vpop.f32.mrb[2].mxu0 }
 0x162   :  { %v709_v61 = vpop.f32.mrb[3].mxu0 }
 0x163   :  { %v710_v62 = vadd.f32 %v709_v61, %v708_v60 }
 0x166   :  { %v752_v63 = vpop.f32.mrb[2].mxu1 }
 0x167   :  { %v753_v0 = vpop.f32.mrb[3].mxu1 }
 0x168   :  { %v754_v2 = vadd.f32 %v753_v0, %v752_v63 }
 0x16a   :  { %v467_v3 = vadd.f32 %v754_v2, %v710_v62 }
 0x16d   :  { %v711_v9 = vpop.f32.mrb[4].mxu0 }
 0x16e   :  { %v712_v10 = vpop.f32.mrb[5].mxu0 }
 0x16f   :  { %v713_v11 = vadd.f32 %v712_v10, %v711_v9 }
 0x175   :  { %v755_v12 = vpop.f32.mrb[4].mxu1 }
 0x176   :  { %v756_v13 = vpop.f32.mrb[5].mxu1 }
 0x177   :  { %v757_v14 = vadd.f32 %v756_v13, %v755_v12 }
 0x179   :  { %v714_v15 = vpop.f32.mrb[6].mxu0  ;;  %v472_v16 = vadd.f32 %v757_v14, %v713_v11 }
 0x17a   :  { %v715_v17 = vpop.f32.mrb[7].mxu0 }
 0x17b   :  { %v716_v18 = vadd.f32 %v715_v17, %v714_v15  ;;  %v635_v17 = vld [vmem:[%s1408_s3] sm:$0x1] }
 0x17e   :  { %v758_v19 = vpop.f32.mrb[6].mxu1 }
 0x17f   :  { %v759_v20 = vpop.f32.mrb[7].mxu1 }
 0x180   :  { %v760_v21 = vadd.f32 %v759_v20, %v758_v19  ;;  %v625_v20 = vld [vmem:[%s1409_s4] sm:$0x1] }
 0x182   :  { %v815_v22 = vpop.f32.mrb[8].mxu0  ;;  %v477_v23 = vadd.f32 %v760_v21, %v716_v18  ;;  %v657_v18 = vld [vmem:[%s1408_s3] sm:$0x1]  ;;  %v647_v21 = vld [vmem:[%s1409_s4 + $0x1] sm:$0x1] }
 0x183   :  { %v552_v24 = vadd.f32 %v815_v22, %v467_v3  ;;  %v546_v25 = vpop.f32.mrb[9].mxu0  ;;  %v636_v22 = vmul.f32 %v635_v17, %v625_v20 }
 0x184   :  { %v547_v26 = vadd.f32 %v546_v25, %v462_v59 }
 0x186   :  { %v818_v27 = vpop.f32.mrb[8].mxu1  ;;  %v565_v30 = vadd.f32 %v552_v24, %v547_v26 }
 0x187   :  { %v562_v28 = vadd.f32 %v818_v27, %v477_v23  ;;  %v556_v29 = vpop.f32.mrb[9].mxu1  ;;  %v658_v23 = vmul.f32 %v657_v18, %v647_v21  ;;  %v641_v27 = vrot.slane %v636_v22, %v589_v48 }
 0x188   :  { %v557_v31 = vadd.f32 %v556_v29, %v472_v16  ;;  %v621_v16 = vld [vmem:[%s1407_s2] sm:$0x1] }
 0x18a   :  { %v566_v32 = vadd.f32 %v565_v30, %v557_v31 }
 0x18c   :  { %v567_v33 = vadd.f32 %v566_v32, %v562_v28 }
 0x18e   :  { %v568_v34 = vrot.slane %v567_v33, 4 }
 0x190   :  { %v569_v35 = vadd.f32 %v568_v34, %v567_v33 }
 0x192   :  { %v570_v36 = vrot.slane %v569_v35, 2 }
 0x194   :  { %v571_v37 = vadd.f32 %v570_v36, %v569_v35 }
 0x196   :  { %v572_v38 = vrot.slane %v571_v37, 1 }
 0x198   :  { %v573_v39 = vadd.f32 %v572_v38, %v571_v37 }
 0x19a   :  { %574 = vrot.lane.b32.xlu0 %v573_v39, %s948_s1 }
 0x20c   :  { %v575_v40 = vpop.permute.xlu0 %574 }
 0x20d   :  { %v576_v41 = vadd.f32 %v575_v40, %v573_v39 }
 0x20f   :  { %577 = vrot.lane.b32.xlu1 %v576_v41, %s949_s18 }
 0x281   :  { %v578_v42 = vpop.permute.xlu1 %577 }
 0x282   :  { %v579_v43 = vadd.f32 %v578_v42, %v576_v41 }
 0x284   :  { %580 = vrot.lane.b32.xlu0 %v579_v43, %s950_s24 }
 0x2f6   :  { %v581_v44 = vpop.permute.xlu0 %580 }
 0x2f7   :  { %v582_v5 = vadd.f32 %v581_v44, %v579_v43 }
 0x2f9   :  { %583 = vrot.lane.b32.xlu1 %v582_v5, %s944_s17 }
 0x36b   :  { %v584_v47 = vpop.permute.xlu1 %583 }
 0x36c   :  { %v585_v49 = vadd.f32 %v584_v47, %v582_v5 }
 0x36e   :  { %v586_v50 = vmul.f32 0.001953125, %v585_v49 }
 0x370   :  { %v590_v51 = vrot.slane %v586_v50, %v589_v48 }
 0x372   :  { %v591_v52 = vsub.f32 %v547_v26, %v590_v51  ;;  %v592_v7 = vsub.f32 %v552_v24, %v590_v51  ;;  %v593_v53 = vsub.f32 %v557_v31, %v590_v51  ;;  %v594_v54 = vsub.f32 %v562_v28, %v590_v51 }
 0x373   :  { %v663_v28 = vrot.slane %v658_v23, %v589_v48 }
 0x374   :  { %v595_v55 = vmul.f32 %v591_v52, %v591_v52  ;;  %v596_v1 = vmul.f32 %v592_v7, %v592_v7  ;;  %v597_v4 = vmul.f32 %v593_v53, %v593_v53  ;;  %v598_v8 = vmul.f32 %v594_v54, %v594_v54 }
 0x376   :  { %v599_v6 = vadd.f32 %v596_v1, %v595_v55 }
 0x378   :  { %v600_v56 = vadd.f32 %v599_v6, %v597_v4 }
 0x37a   :  { %v601_v57 = vadd.f32 %v600_v56, %v598_v8 }
 0x37c   :  { %v602_v58 = vrot.slane %v601_v57, 4 }
 0x37e   :  { %v603_v59 = vadd.f32 %v602_v58, %v601_v57 }
 0x380   :  { %v604_v60 = vrot.slane %v603_v59, 2 }
 0x382   :  { %v605_v61 = vadd.f32 %v604_v60, %v603_v59 }
 0x384   :  { %v606_v62 = vrot.slane %v605_v61, 1 }
 0x386   :  { %v607_v63 = vadd.f32 %v606_v62, %v605_v61 }
 0x388   :  { %608 = vrot.lane.b32.xlu0 %v607_v63, %s948_s1 }
 0x3fa   :  { %v609_v0 = vpop.permute.xlu0 %608 }
 0x3fb   :  { %v610_v2 = vadd.f32 %v609_v0, %v607_v63 }
 0x3fd   :  { %611 = vrot.lane.b32.xlu1 %v610_v2, %s949_s18 }
 0x46f   :  { %v612_v3 = vpop.permute.xlu1 %611 }
 0x470   :  { %v613_v9 = vadd.f32 %v612_v3, %v610_v2 }
 0x472   :  { %614 = vrot.lane.b32.xlu0 %v613_v9, %s950_s24 }
 0x4e4   :  { %v615_v10 = vpop.permute.xlu0 %614 }
 0x4e5   :  { %v616_v11 = vadd.f32 %v615_v10, %v613_v9 }
 0x4e7   :  { %617 = vrot.lane.b32.xlu1 %v616_v11, %s944_s17 }
 0x559   :  { %v618_v12 = vpop.permute.xlu1 %617 }
 0x55a   :  { %v619_v13 = vadd.f32 %v618_v12, %v616_v11 }
 0x55c   :  { %v620_v14 = vmul.f32 0.001953125, %v619_v13 }
 0x55e   :  { %v622_v15 = vadd.f32 1e-05, %v620_v14 }
 0x560   :  { %940 = vrsqrt.f32 %v622_v15 }
 0x56a   :  { %v941_v19 = vpop.eup %940 }
 0x56b   :  { %v624_v24 = vmul.f32 %v941_v19, %v621_v16 }
 0x56d   :  { %v626_v25 = vmul.f32 %v625_v20, %v624_v24  ;;  %v648_v26 = vmul.f32 %v647_v21, %v624_v24 }
 0x56f   :  { %v631_v29 = vrot.slane %v626_v25, %v589_v48  ;;  %v653_v30 = vrot.slane %v648_v26, %v589_v48 }
 0x571   :  { %v633_v31 = vmul.f32 %v631_v29, %v591_v52  ;;  %v634_v32 = vmul.f32 %v631_v29, %v592_v7  ;;  %v655_v33 = vmul.f32 %v653_v30, %v593_v53  ;;  %v656_v34 = vmul.f32 %v653_v30, %v594_v54 }
 0x573   :  { %v643_v35 = vadd.f32 %v641_v27, %v633_v31  ;;  %v644_v36 = vadd.f32 %v641_v27, %v634_v32  ;;  %v665_v37 = vadd.f32 %v663_v28, %v655_v33  ;;  %v666_v38 = vadd.f32 %v663_v28, %v656_v34 }
 0x575   :  { %645 = vst [vmem:[%s1410_s5] sm:$0xff] %v643_v35  ;;  %646 = vst [vmem:[%s1410_s5 + $0x8] sm:$0xff] %v644_v36 }
 0x576   :  { %667 = vst [vmem:[%s1410_s5 + $0x10] sm:$0xff] %v665_v37  ;;  %668 = vst [vmem:[%s1410_s5 + $0x18] sm:$0xff] %v666_v38 }

</bundles_post_ra>
